<compile_context>
chip_gen: v7x
topology: tpu7x:2x2x1
jax: 0.10.0
libtpu: 0.0.40
codegen_flags: <defaults>
</compile_context>

<pallas_src>
import jax
import jax.numpy as jnp
from jax.experimental import pallas as pl
from jax.experimental.pallas import tpu as pltpu


# ---------------------------------------------------------------------------
# Fused kernel: (folded proj + input matmul for all T) -> unrolled LSTM
# recurrence -> LayerNorm over the whole output slab.  Single grid step.
# ---------------------------------------------------------------------------
def lstm_unit_kernel(x_ref, wc_ref, bc_ref, whh_ref, g_ref, beta_ref,
                     y_ref, hn_ref, cn_ref, hs_ref):
    # x_ref:   (T*N, V*C)  time-major rows (row = t*N + n), feature = v*C + c
    # wc_ref:  (V*C, 4H)   projection folded into W_ih, transposed
    # bc_ref:  (1, 4H)     b_ih + b_hh + W_ih @ tile(bp, V)
    # whh_ref: (H, 4H)     W_hh transposed
    # g_ref / beta_ref: (1, H)  LayerNorm affine
    # y_ref:   (T*N, H)    LayerNorm(h_t), time-major rows
    # hn_ref / cn_ref: (N, H) final hidden / cell state
    # hs_ref:  (T*N, H)    VMEM scratch for raw hidden states
    N, H = hn_ref.shape
    T = x_ref.shape[0] // N

    # Input path hoisted out of the recurrence: one MXU pass (contraction = V*C)
    # for every timestep at once.  Gate order is PyTorch's (i, f, g, o).
    gates_x = (
        jnp.dot(x_ref[...], wc_ref[...], preferred_element_type=jnp.float32)
        + bc_ref[...]
    )                                               # (T*N, 4H)

    whh = whh_ref[...]                              # resident (H, 4H)
    h = jnp.zeros((N, H), jnp.float32)
    c = jnp.zeros((N, H), jnp.float32)

    for t in range(T):                              # small static T: fully unrolled
        gates = gates_x[t * N:(t + 1) * N, :] + jnp.dot(
            h, whh, preferred_element_type=jnp.float32)          # (N, 4H)
        sig = jax.nn.sigmoid(gates)                 # one full-width pass covers i, f, o
        i_g = sig[:, 0 * H:1 * H]
        f_g = sig[:, 1 * H:2 * H]
        o_g = sig[:, 3 * H:4 * H]
        g_g = jnp.tanh(gates[:, 2 * H:3 * H])
        c = f_g * c + i_g * g_g
        h = o_g * jnp.tanh(c)
        hs_ref[pl.ds(t * N, N), :] = h

    hn_ref[...] = h.astype(hn_ref.dtype)            # written once, at the end
    cn_ref[...] = c.astype(cn_ref.dtype)

    # LayerNorm over the hidden dim on the whole (T*N, H) slab, single store.
    hs = hs_ref[...]
    mean = jnp.mean(hs, axis=-1, keepdims=True)
    var = jnp.mean((hs - mean) ** 2, axis=-1, keepdims=True)
    normed = (hs - mean) * jax.lax.rsqrt(var + 1e-5)
    y_ref[...] = (normed * g_ref[...] + beta_ref[...]).astype(y_ref.dtype)


# ---------------------------------------------------------------------------
# Parameter folding (plain JAX, runs once on weights)
# ---------------------------------------------------------------------------
def _fold_params(params, V):
    Wp = params["Wp"].astype(jnp.float32)           # (Cp, C)
    bp = params["bp"].astype(jnp.float32)           # (Cp,)
    W_ih = params["W_ih"].astype(jnp.float32)       # (4H, V*Cp)
    H4 = W_ih.shape[0]
    Cp, C = Wp.shape
    # gates_x = reshape(proj(x)) @ W_ih^T + b_ih  ==  x_flat @ W_comb^T + b_comb
    W_comb = jnp.einsum("gvp,pc->gvc", W_ih.reshape(H4, V, Cp), Wp)
    W_comb = W_comb.reshape(H4, V * C)              # (4H, V*C)
    b_comb = (params["b_ih"].astype(jnp.float32)
              + params["b_hh"].astype(jnp.float32)
              + W_ih @ jnp.tile(bp, V))             # (4H,)
    return W_comb, b_comb


# ---------------------------------------------------------------------------
# Full LSTMUnit forward (glue in plain JAX around the single kernel)
# ---------------------------------------------------------------------------
def lstm_unit_forward(x, params, original_shape=True):
    N, C, T, V = x.shape
    H = params["W_hh"].shape[1]
    H4 = 4 * H

    # Time-major flattening: row = t*N + n, feature = v*C + c
    # (matches permute(0,2,3,1).view(N,T,-1) with the projection folded in).
    x_tm = jnp.transpose(x, (2, 0, 3, 1)).reshape(T * N, V * C).astype(jnp.float32)

    W_comb, b_comb = _fold_params(params, V)
    # Weights kept in f32 (keeps the 2e-4 check tight; bf16 MXU inputs are an
    # option on v6e/v7x if a looser tolerance is acceptable).
    wc_t = W_comb.T                                           # (V*C, 4H)
    bc2 = b_comb.reshape(1, H4)
    whh_t = params["W_hh"].T.astype(jnp.float32)              # (H, 4H)
    g2 = params["gamma"].reshape(1, H).astype(jnp.float32)
    be2 = params["beta"].reshape(1, H).astype(jnp.float32)

    grid_spec = pltpu.PrefetchScalarGridSpec(
        num_scalar_prefetch=0,
        grid=(1,),
        in_specs=[
            pl.BlockSpec((T * N, V * C), lambda i: (0, 0)),   # x (time-major)
            pl.BlockSpec((V * C, H4), lambda i: (0, 0)),      # W_comb^T
            pl.BlockSpec((1, H4), lambda i: (0, 0)),          # b_comb
            pl.BlockSpec((H, H4), lambda i: (0, 0)),          # W_hh^T
            pl.BlockSpec((1, H), lambda i: (0, 0)),           # gamma
            pl.BlockSpec((1, H), lambda i: (0, 0)),           # beta
        ],
        out_specs=[
            pl.BlockSpec((T * N, H), lambda i: (0, 0)),       # y slab
            pl.BlockSpec((N, H), lambda i: (0, 0)),           # hn
            pl.BlockSpec((N, H), lambda i: (0, 0)),           # cn
        ],
        scratch_shapes=[pltpu.VMEM((T * N, H), jnp.float32)], # raw hidden states
    )

    y_tm, hn, cn = pl.pallas_call(
        lstm_unit_kernel,
        out_shape=(
            jax.ShapeDtypeStruct((T * N, H), jnp.float32),
            jax.ShapeDtypeStruct((N, H), jnp.float32),
            jax.ShapeDtypeStruct((N, H), jnp.float32),
        ),
        grid_spec=grid_spec,
        compiler_params=pltpu.CompilerParams(dimension_semantics=("arbitrary",)),
    )(x_tm, wc_t, bc2, whh_t, g2, be2)

    y = jnp.transpose(y_tm.reshape(T, N, H), (1, 0, 2))       # (N, T, H)
    hn = hn[None]                                             # (1, N, H)
    cn = cn[None]
    if original_shape:
        y = jnp.transpose(y.reshape(N, T, V, -1), (0, 3, 1, 2))  # (N, H//V, T, V)
    return y, hn, cn


# ---------------------------------------------------------------------------
# Pure-JAX reference (unfused, mirrors the PyTorch module) for correctness
# ---------------------------------------------------------------------------
def reference_forward(x, params, original_shape=True):
    N, C, T, V = x.shape
    xp = jnp.transpose(x, (0, 2, 3, 1))
    pr = xp @ params["Wp"].T + params["bp"]
    xs = pr.reshape(N, T, -1)
    H = params["W_hh"].shape[1]

    def step(carry, x_t):
        h, c = carry
        gates = (x_t @ params["W_ih"].T + params["b_ih"]
                 + h @ params["W_hh"].T + params["b_hh"])
        i = jax.nn.sigmoid(gates[:, :H])
        f = jax.nn.sigmoid(gates[:, H:2 * H])
        g = jnp.tanh(gates[:, 2 * H:3 * H])
        o = jax.nn.sigmoid(gates[:, 3 * H:])
        c = f * c + i * g
        h = o * jnp.tanh(c)
        return (h, c), h

    (hn, cn), ys = jax.lax.scan(
        step,
        (jnp.zeros((N, H), jnp.float32), jnp.zeros((N, H), jnp.float32)),
        jnp.transpose(xs, (1, 0, 2)))
    y = jnp.transpose(ys, (1, 0, 2))
    mean = y.mean(-1, keepdims=True)
    var = ((y - mean) ** 2).mean(-1, keepdims=True)
    y = (y - mean) / jnp.sqrt(var + 1e-5) * params["gamma"] + params["beta"]
    if original_shape:
        y = jnp.transpose(y.reshape(N, T, V, -1), (0, 3, 1, 2))
    return y, hn[None], cn[None]


if __name__ == "__main__":
    # N=2, C=8 (proj_in_channels), T=8, V=16, proj_factor=4
    #  -> Cp = 2, D = H = V * Cp = 32, contraction for the fused matmul = V*C = 128
    N, C, T, V = 2, 8, 8, 16
    proj_factor = 4
    Cp = C // proj_factor
    D = V * Cp
    H = D  # unidirectional

    key = jax.random.PRNGKey(0)
    ks = jax.random.split(key, 8)
    x = jax.random.normal(ks[0], (N, C, T, V), jnp.float32)

    scale = 1.0 / float(jnp.sqrt(jnp.float32(H)))
    params = dict(
        Wp=jax.random.normal(ks[1], (Cp, C), jnp.float32) * 0.3,
        bp=jax.random.normal(ks[2], (Cp,), jnp.float32) * 0.1,
        W_ih=jax.random.uniform(ks[3], (4 * H, D), jnp.float32, -scale, scale),
        W_hh=jax.random.uniform(ks[4], (4 * H, H), jnp.float32, -scale, scale),
        b_ih=jax.random.uniform(ks[5], (4 * H,), jnp.float32, -scale, scale),
        b_hh=jax.random.uniform(ks[6], (4 * H,), jnp.float32, -scale, scale),
        gamma=jnp.ones((H,), jnp.float32),
        beta=jnp.zeros((H,), jnp.float32),
    )

    y, hn, cn = lstm_unit_forward(x, params, original_shape=True)
    jax.block_until_ready((y, hn, cn))

    y_r, hn_r, cn_r = reference_forward(x, params, original_shape=True)
    assert y.shape == (N, H // V, T, V) and hn.shape == (1, N, H) and cn.shape == (1, N, H)
    assert jnp.allclose(y, y_r, atol=2e-4, rtol=2e-4)
    assert jnp.allclose(hn, hn_r, atol=2e-4, rtol=2e-4)
    assert jnp.allclose(cn, cn_r, atol=2e-4, rtol=2e-4)
    print("KERNEL_OK")
</pallas_src>

<mosaic_0001>
module attributes {stable_mosaic.version = 11 : i64} {
  func.func @lstm_unit_kernel(%arg0: i32, %arg1: memref<16x128xf32, #tpu.memory_space<vmem>>, %arg2: memref<128x128xf32, #tpu.memory_space<vmem>>, %arg3: memref<1x128xf32, #tpu.memory_space<vmem>>, %arg4: memref<32x128xf32, #tpu.memory_space<vmem>>, %arg5: memref<1x32xf32, #tpu.memory_space<vmem>>, %arg6: memref<1x32xf32, #tpu.memory_space<vmem>>, %arg7: memref<16x32xf32, #tpu.memory_space<vmem>>, %arg8: memref<2x32xf32, #tpu.memory_space<vmem>>, %arg9: memref<2x32xf32, #tpu.memory_space<vmem>>, %arg10: memref<16x32xf32, #tpu.memory_space<vmem>>) attributes {dimension_semantics = [#tpu.dimension_semantics<arbitrary>], iteration_bounds = array<i64: 1>, scalar_prefetch = 0 : i64, scratch_operands = 1 : i64, tpu.core_type = #tpu.core_type<tc>, window_params = [{pipeline_mode = #tpu.pipeline_mode<synchronous>, transform_indices = @transform_0, window_bounds = array<i64: 16, 128>}, {pipeline_mode = #tpu.pipeline_mode<synchronous>, transform_indices = @transform_1, window_bounds = array<i64: 128, 128>}, {pipeline_mode = #tpu.pipeline_mode<synchronous>, transform_indices = @transform_2, window_bounds = array<i64: 1, 128>}, {pipeline_mode = #tpu.pipeline_mode<synchronous>, transform_indices = @transform_3, window_bounds = array<i64: 32, 128>}, {pipeline_mode = #tpu.pipeline_mode<synchronous>, transform_indices = @transform_4, window_bounds = array<i64: 1, 32>}, {pipeline_mode = #tpu.pipeline_mode<synchronous>, transform_indices = @transform_5, window_bounds = array<i64: 1, 32>}, {pipeline_mode = #tpu.pipeline_mode<synchronous>, transform_indices = @transform_6, window_bounds = array<i64: 16, 32>}, {pipeline_mode = #tpu.pipeline_mode<synchronous>, transform_indices = @transform_7, window_bounds = array<i64: 2, 32>}, {pipeline_mode = #tpu.pipeline_mode<synchronous>, transform_indices = @transform_8, window_bounds = array<i64: 2, 32>}]} {
    %c0 = arith.constant 0 : index
    %c0_0 = arith.constant 0 : index
    %0 = vector.load %arg1[%c0, %c0_0] : memref<16x128xf32, #tpu.memory_space<vmem>>, vector<16x128xf32>
    %c0_1 = arith.constant 0 : index
    %c0_2 = arith.constant 0 : index
    %1 = vector.load %arg2[%c0_1, %c0_2] : memref<128x128xf32, #tpu.memory_space<vmem>>, vector<128x128xf32>
    %cst = arith.constant dense<0.000000e+00> : vector<16x128xf32>
    %2 = tpu.matmul %0, %1, %cst {dimension_numbers = #tpu.dot_dimension_numbers<[1], [0], [0], [1], [0, 0, 1, 1], [], []>} : vector<16x128xf32>, vector<128x128xf32>, vector<16x128xf32> -> vector<16x128xf32>
    %c0_3 = arith.constant 0 : index
    %c0_4 = arith.constant 0 : index
    %3 = vector.load %arg3[%c0_3, %c0_4] : memref<1x128xf32, #tpu.memory_space<vmem>>, vector<1x128xf32>
    %4 = vector.broadcast %3 : vector<1x128xf32> to vector<16x128xf32>
    %5 = arith.addf %2, %4 : vector<16x128xf32>
    %c0_5 = arith.constant 0 : index
    %c0_6 = arith.constant 0 : index
    %6 = vector.load %arg4[%c0_5, %c0_6] : memref<32x128xf32, #tpu.memory_space<vmem>>, vector<32x128xf32>
    %cst_7 = arith.constant 0.000000e+00 : f32
    %7 = vector.broadcast %cst_7 : f32 to vector<2x32xf32>
    %cst_8 = arith.constant 0.000000e+00 : f32
    %8 = vector.broadcast %cst_8 : f32 to vector<2x32xf32>
    %9 = vector.extract_strided_slice %5 {offsets = [0, 0], sizes = [2, 128], strides = [1, 1]} : vector<16x128xf32> to vector<2x128xf32>
    %cst_9 = arith.constant dense<0.000000e+00> : vector<2x128xf32>
    %10 = tpu.matmul %7, %6, %cst_9 {dimension_numbers = #tpu.dot_dimension_numbers<[1], [0], [0], [1], [0, 0, 1, 1], [], []>} : vector<2x32xf32>, vector<32x128xf32>, vector<2x128xf32> -> vector<2x128xf32>
    %11 = arith.addf %9, %10 : vector<2x128xf32>
    %12 = arith.negf %11 : vector<2x128xf32>
    %13 = math.exp %12 : vector<2x128xf32>
    %cst_10 = arith.constant 1.000000e+00 : f32
    %14 = vector.broadcast %cst_10 : f32 to vector<2x128xf32>
    %15 = arith.addf %14, %13 : vector<2x128xf32>
    %16 = arith.divf %14, %15 : vector<2x128xf32>
    %17 = vector.extract_strided_slice %16 {offsets = [0, 0], sizes = [2, 32], strides = [1, 1]} : vector<2x128xf32> to vector<2x32xf32>
    %18 = vector.extract_strided_slice %16 {offsets = [0, 32], sizes = [2, 32], strides = [1, 1]} : vector<2x128xf32> to vector<2x32xf32>
    %19 = vector.extract_strided_slice %16 {offsets = [0, 96], sizes = [2, 32], strides = [1, 1]} : vector<2x128xf32> to vector<2x32xf32>
    %20 = vector.extract_strided_slice %11 {offsets = [0, 64], sizes = [2, 32], strides = [1, 1]} : vector<2x128xf32> to vector<2x32xf32>
    %21 = math.tanh %20 : vector<2x32xf32>
    %22 = arith.mulf %18, %8 : vector<2x32xf32>
    %23 = arith.mulf %17, %21 : vector<2x32xf32>
    %24 = arith.addf %22, %23 : vector<2x32xf32>
    %25 = math.tanh %24 : vector<2x32xf32>
    %26 = arith.mulf %19, %25 : vector<2x32xf32>
    %c0_11 = arith.constant 0 : index
    %c0_12 = arith.constant 0 : index
    %27 = vector.load %arg10[%c0_11, %c0_12] : memref<16x32xf32, #tpu.memory_space<vmem>>, vector<2x32xf32>
    tpu.vector_store %arg10[%c0_11, %c0_12], %26 {strides = array<i32>} : memref<16x32xf32, #tpu.memory_space<vmem>>, vector<2x32xf32>,
    %28 = vector.extract_strided_slice %5 {offsets = [2, 0], sizes = [2, 128], strides = [1, 1]} : vector<16x128xf32> to vector<2x128xf32>
    %cst_13 = arith.constant dense<0.000000e+00> : vector<2x128xf32>
    %29 = tpu.matmul %26, %6, %cst_13 {dimension_numbers = #tpu.dot_dimension_numbers<[1], [0], [0], [1], [0, 0, 1, 1], [], []>} : vector<2x32xf32>, vector<32x128xf32>, vector<2x128xf32> -> vector<2x128xf32>
    %30 = arith.addf %28, %29 : vector<2x128xf32>
    %31 = arith.negf %30 : vector<2x128xf32>
    %32 = math.exp %31 : vector<2x128xf32>
    %cst_14 = arith.constant 1.000000e+00 : f32
    %33 = vector.broadcast %cst_14 : f32 to vector<2x128xf32>
    %34 = arith.addf %33, %32 : vector<2x128xf32>
    %35 = arith.divf %33, %34 : vector<2x128xf32>
    %36 = vector.extract_strided_slice %35 {offsets = [0, 0], sizes = [2, 32], strides = [1, 1]} : vector<2x128xf32> to vector<2x32xf32>
    %37 = vector.extract_strided_slice %35 {offsets = [0, 32], sizes = [2, 32], strides = [1, 1]} : vector<2x128xf32> to vector<2x32xf32>
    %38 = vector.extract_strided_slice %35 {offsets = [0, 96], sizes = [2, 32], strides = [1, 1]} : vector<2x128xf32> to vector<2x32xf32>
    %39 = vector.extract_strided_slice %30 {offsets = [0, 64], sizes = [2, 32], strides = [1, 1]} : vector<2x128xf32> to vector<2x32xf32>
    %40 = math.tanh %39 : vector<2x32xf32>
    %41 = arith.mulf %37, %24 : vector<2x32xf32>
    %42 = arith.mulf %36, %40 : vector<2x32xf32>
    %43 = arith.addf %41, %42 : vector<2x32xf32>
    %44 = math.tanh %43 : vector<2x32xf32>
    %45 = arith.mulf %38, %44 : vector<2x32xf32>
    %c2 = arith.constant 2 : index
    %c0_15 = arith.constant 0 : index
    %46 = vector.load %arg10[%c2, %c0_15] : memref<16x32xf32, #tpu.memory_space<vmem>>, vector<2x32xf32>
    tpu.vector_store %arg10[%c2, %c0_15], %45 {strides = array<i32>} : memref<16x32xf32, #tpu.memory_space<vmem>>, vector<2x32xf32>,
    %47 = vector.extract_strided_slice %5 {offsets = [4, 0], sizes = [2, 128], strides = [1, 1]} : vector<16x128xf32> to vector<2x128xf32>
    %cst_16 = arith.constant dense<0.000000e+00> : vector<2x128xf32>
    %48 = tpu.matmul %45, %6, %cst_16 {dimension_numbers = #tpu.dot_dimension_numbers<[1], [0], [0], [1], [0, 0, 1, 1], [], []>} : vector<2x32xf32>, vector<32x128xf32>, vector<2x128xf32> -> vector<2x128xf32>
    %49 = arith.addf %47, %48 : vector<2x128xf32>
    %50 = arith.negf %49 : vector<2x128xf32>
    %51 = math.exp %50 : vector<2x128xf32>
    %cst_17 = arith.constant 1.000000e+00 : f32
    %52 = vector.broadcast %cst_17 : f32 to vector<2x128xf32>
    %53 = arith.addf %52, %51 : vector<2x128xf32>
    %54 = arith.divf %52, %53 : vector<2x128xf32>
    %55 = vector.extract_strided_slice %54 {offsets = [0, 0], sizes = [2, 32], strides = [1, 1]} : vector<2x128xf32> to vector<2x32xf32>
    %56 = vector.extract_strided_slice %54 {offsets = [0, 32], sizes = [2, 32], strides = [1, 1]} : vector<2x128xf32> to vector<2x32xf32>
    %57 = vector.extract_strided_slice %54 {offsets = [0, 96], sizes = [2, 32], strides = [1, 1]} : vector<2x128xf32> to vector<2x32xf32>
    %58 = vector.extract_strided_slice %49 {offsets = [0, 64], sizes = [2, 32], strides = [1, 1]} : vector<2x128xf32> to vector<2x32xf32>
    %59 = math.tanh %58 : vector<2x32xf32>
    %60 = arith.mulf %56, %43 : vector<2x32xf32>
    %61 = arith.mulf %55, %59 : vector<2x32xf32>
    %62 = arith.addf %60, %61 : vector<2x32xf32>
    %63 = math.tanh %62 : vector<2x32xf32>
    %64 = arith.mulf %57, %63 : vector<2x32xf32>
    %c4 = arith.constant 4 : index
    %c0_18 = arith.constant 0 : index
    %65 = vector.load %arg10[%c4, %c0_18] : memref<16x32xf32, #tpu.memory_space<vmem>>, vector<2x32xf32>
    tpu.vector_store %arg10[%c4, %c0_18], %64 {strides = array<i32>} : memref<16x32xf32, #tpu.memory_space<vmem>>, vector<2x32xf32>,
    %66 = vector.extract_strided_slice %5 {offsets = [6, 0], sizes = [2, 128], strides = [1, 1]} : vector<16x128xf32> to vector<2x128xf32>
    %cst_19 = arith.constant dense<0.000000e+00> : vector<2x128xf32>
    %67 = tpu.matmul %64, %6, %cst_19 {dimension_numbers = #tpu.dot_dimension_numbers<[1], [0], [0], [1], [0, 0, 1, 1], [], []>} : vector<2x32xf32>, vector<32x128xf32>, vector<2x128xf32> -> vector<2x128xf32>
    %68 = arith.addf %66, %67 : vector<2x128xf32>
    %69 = arith.negf %68 : vector<2x128xf32>
    %70 = math.exp %69 : vector<2x128xf32>
    %cst_20 = arith.constant 1.000000e+00 : f32
    %71 = vector.broadcast %cst_20 : f32 to vector<2x128xf32>
    %72 = arith.addf %71, %70 : vector<2x128xf32>
    %73 = arith.divf %71, %72 : vector<2x128xf32>
    %74 = vector.extract_strided_slice %73 {offsets = [0, 0], sizes = [2, 32], strides = [1, 1]} : vector<2x128xf32> to vector<2x32xf32>
    %75 = vector.extract_strided_slice %73 {offsets = [0, 32], sizes = [2, 32], strides = [1, 1]} : vector<2x128xf32> to vector<2x32xf32>
    %76 = vector.extract_strided_slice %73 {offsets = [0, 96], sizes = [2, 32], strides = [1, 1]} : vector<2x128xf32> to vector<2x32xf32>
    %77 = vector.extract_strided_slice %68 {offsets = [0, 64], sizes = [2, 32], strides = [1, 1]} : vector<2x128xf32> to vector<2x32xf32>
    %78 = math.tanh %77 : vector<2x32xf32>
    %79 = arith.mulf %75, %62 : vector<2x32xf32>
    %80 = arith.mulf %74, %78 : vector<2x32xf32>
    %81 = arith.addf %79, %80 : vector<2x32xf32>
    %82 = math.tanh %81 : vector<2x32xf32>
    %83 = arith.mulf %76, %82 : vector<2x32xf32>
    %c6 = arith.constant 6 : index
    %c0_21 = arith.constant 0 : index
    %84 = vector.load %arg10[%c6, %c0_21] : memref<16x32xf32, #tpu.memory_space<vmem>>, vector<2x32xf32>
    tpu.vector_store %arg10[%c6, %c0_21], %83 {strides = array<i32>} : memref<16x32xf32, #tpu.memory_space<vmem>>, vector<2x32xf32>,
    %85 = vector.extract_strided_slice %5 {offsets = [8, 0], sizes = [2, 128], strides = [1, 1]} : vector<16x128xf32> to vector<2x128xf32>
    %cst_22 = arith.constant dense<0.000000e+00> : vector<2x128xf32>
    %86 = tpu.matmul %83, %6, %cst_22 {dimension_numbers = #tpu.dot_dimension_numbers<[1], [0], [0], [1], [0, 0, 1, 1], [], []>} : vector<2x32xf32>, vector<32x128xf32>, vector<2x128xf32> -> vector<2x128xf32>
    %87 = arith.addf %85, %86 : vector<2x128xf32>
    %88 = arith.negf %87 : vector<2x128xf32>
    %89 = math.exp %88 : vector<2x128xf32>
    %cst_23 = arith.constant 1.000000e+00 : f32
    %90 = vector.broadcast %cst_23 : f32 to vector<2x128xf32>
    %91 = arith.addf %90, %89 : vector<2x128xf32>
    %92 = arith.divf %90, %91 : vector<2x128xf32>
    %93 = vector.extract_strided_slice %92 {offsets = [0, 0], sizes = [2, 32], strides = [1, 1]} : vector<2x128xf32> to vector<2x32xf32>
    %94 = vector.extract_strided_slice %92 {offsets = [0, 32], sizes = [2, 32], strides = [1, 1]} : vector<2x128xf32> to vector<2x32xf32>
    %95 = vector.extract_strided_slice %92 {offsets = [0, 96], sizes = [2, 32], strides = [1, 1]} : vector<2x128xf32> to vector<2x32xf32>
    %96 = vector.extract_strided_slice %87 {offsets = [0, 64], sizes = [2, 32], strides = [1, 1]} : vector<2x128xf32> to vector<2x32xf32>
    %97 = math.tanh %96 : vector<2x32xf32>
    %98 = arith.mulf %94, %81 : vector<2x32xf32>
    %99 = arith.mulf %93, %97 : vector<2x32xf32>
    %100 = arith.addf %98, %99 : vector<2x32xf32>
    %101 = math.tanh %100 : vector<2x32xf32>
    %102 = arith.mulf %95, %101 : vector<2x32xf32>
    %c8 = arith.constant 8 : index
    %c0_24 = arith.constant 0 : index
    %103 = vector.load %arg10[%c8, %c0_24] : memref<16x32xf32, #tpu.memory_space<vmem>>, vector<2x32xf32>
    tpu.vector_store %arg10[%c8, %c0_24], %102 {strides = array<i32>} : memref<16x32xf32, #tpu.memory_space<vmem>>, vector<2x32xf32>,
    %104 = vector.extract_strided_slice %5 {offsets = [10, 0], sizes = [2, 128], strides = [1, 1]} : vector<16x128xf32> to vector<2x128xf32>
    %cst_25 = arith.constant dense<0.000000e+00> : vector<2x128xf32>
    %105 = tpu.matmul %102, %6, %cst_25 {dimension_numbers = #tpu.dot_dimension_numbers<[1], [0], [0], [1], [0, 0, 1, 1], [], []>} : vector<2x32xf32>, vector<32x128xf32>, vector<2x128xf32> -> vector<2x128xf32>
    %106 = arith.addf %104, %105 : vector<2x128xf32>
    %107 = arith.negf %106 : vector<2x128xf32>
    %108 = math.exp %107 : vector<2x128xf32>
    %cst_26 = arith.constant 1.000000e+00 : f32
    %109 = vector.broadcast %cst_26 : f32 to vector<2x128xf32>
    %110 = arith.addf %109, %108 : vector<2x128xf32>
    %111 = arith.divf %109, %110 : vector<2x128xf32>
    %112 = vector.extract_strided_slice %111 {offsets = [0, 0], sizes = [2, 32], strides = [1, 1]} : vector<2x128xf32> to vector<2x32xf32>
    %113 = vector.extract_strided_slice %111 {offsets = [0, 32], sizes = [2, 32], strides = [1, 1]} : vector<2x128xf32> to vector<2x32xf32>
    %114 = vector.extract_strided_slice %111 {offsets = [0, 96], sizes = [2, 32], strides = [1, 1]} : vector<2x128xf32> to vector<2x32xf32>
    %115 = vector.extract_strided_slice %106 {offsets = [0, 64], sizes = [2, 32], strides = [1, 1]} : vector<2x128xf32> to vector<2x32xf32>
    %116 = math.tanh %115 : vector<2x32xf32>
    %117 = arith.mulf %113, %100 : vector<2x32xf32>
    %118 = arith.mulf %112, %116 : vector<2x32xf32>
    %119 = arith.addf %117, %118 : vector<2x32xf32>
    %120 = math.tanh %119 : vector<2x32xf32>
    %121 = arith.mulf %114, %120 : vector<2x32xf32>
    %c10 = arith.constant 10 : index
    %c0_27 = arith.constant 0 : index
    %122 = vector.load %arg10[%c10, %c0_27] : memref<16x32xf32, #tpu.memory_space<vmem>>, vector<2x32xf32>
    tpu.vector_store %arg10[%c10, %c0_27], %121 {strides = array<i32>} : memref<16x32xf32, #tpu.memory_space<vmem>>, vector<2x32xf32>,
    %123 = vector.extract_strided_slice %5 {offsets = [12, 0], sizes = [2, 128], strides = [1, 1]} : vector<16x128xf32> to vector<2x128xf32>
    %cst_28 = arith.constant dense<0.000000e+00> : vector<2x128xf32>
    %124 = tpu.matmul %121, %6, %cst_28 {dimension_numbers = #tpu.dot_dimension_numbers<[1], [0], [0], [1], [0, 0, 1, 1], [], []>} : vector<2x32xf32>, vector<32x128xf32>, vector<2x128xf32> -> vector<2x128xf32>
    %125 = arith.addf %123, %124 : vector<2x128xf32>
    %126 = arith.negf %125 : vector<2x128xf32>
    %127 = math.exp %126 : vector<2x128xf32>
    %cst_29 = arith.constant 1.000000e+00 : f32
    %128 = vector.broadcast %cst_29 : f32 to vector<2x128xf32>
    %129 = arith.addf %128, %127 : vector<2x128xf32>
    %130 = arith.divf %128, %129 : vector<2x128xf32>
    %131 = vector.extract_strided_slice %130 {offsets = [0, 0], sizes = [2, 32], strides = [1, 1]} : vector<2x128xf32> to vector<2x32xf32>
    %132 = vector.extract_strided_slice %130 {offsets = [0, 32], sizes = [2, 32], strides = [1, 1]} : vector<2x128xf32> to vector<2x32xf32>
    %133 = vector.extract_strided_slice %130 {offsets = [0, 96], sizes = [2, 32], strides = [1, 1]} : vector<2x128xf32> to vector<2x32xf32>
    %134 = vector.extract_strided_slice %125 {offsets = [0, 64], sizes = [2, 32], strides = [1, 1]} : vector<2x128xf32> to vector<2x32xf32>
    %135 = math.tanh %134 : vector<2x32xf32>
    %136 = arith.mulf %132, %119 : vector<2x32xf32>
    %137 = arith.mulf %131, %135 : vector<2x32xf32>
    %138 = arith.addf %136, %137 : vector<2x32xf32>
    %139 = math.tanh %138 : vector<2x32xf32>
    %140 = arith.mulf %133, %139 : vector<2x32xf32>
    %c12 = arith.constant 12 : index
    %c0_30 = arith.constant 0 : index
    %141 = vector.load %arg10[%c12, %c0_30] : memref<16x32xf32, #tpu.memory_space<vmem>>, vector<2x32xf32>
    tpu.vector_store %arg10[%c12, %c0_30], %140 {strides = array<i32>} : memref<16x32xf32, #tpu.memory_space<vmem>>, vector<2x32xf32>,
    %142 = vector.extract_strided_slice %5 {offsets = [14, 0], sizes = [2, 128], strides = [1, 1]} : vector<16x128xf32> to vector<2x128xf32>
    %cst_31 = arith.constant dense<0.000000e+00> : vector<2x128xf32>
    %143 = tpu.matmul %140, %6, %cst_31 {dimension_numbers = #tpu.dot_dimension_numbers<[1], [0], [0], [1], [0, 0, 1, 1], [], []>} : vector<2x32xf32>, vector<32x128xf32>, vector<2x128xf32> -> vector<2x128xf32>
    %144 = arith.addf %142, %143 : vector<2x128xf32>
    %145 = arith.negf %144 : vector<2x128xf32>
    %146 = math.exp %145 : vector<2x128xf32>
    %cst_32 = arith.constant 1.000000e+00 : f32
    %147 = vector.broadcast %cst_32 : f32 to vector<2x128xf32>
    %148 = arith.addf %147, %146 : vector<2x128xf32>
    %149 = arith.divf %147, %148 : vector<2x128xf32>
    %150 = vector.extract_strided_slice %149 {offsets = [0, 0], sizes = [2, 32], strides = [1, 1]} : vector<2x128xf32> to vector<2x32xf32>
    %151 = vector.extract_strided_slice %149 {offsets = [0, 32], sizes = [2, 32], strides = [1, 1]} : vector<2x128xf32> to vector<2x32xf32>
    %152 = vector.extract_strided_slice %149 {offsets = [0, 96], sizes = [2, 32], strides = [1, 1]} : vector<2x128xf32> to vector<2x32xf32>
    %153 = vector.extract_strided_slice %144 {offsets = [0, 64], sizes = [2, 32], strides = [1, 1]} : vector<2x128xf32> to vector<2x32xf32>
    %154 = math.tanh %153 : vector<2x32xf32>
    %155 = arith.mulf %151, %138 : vector<2x32xf32>
    %156 = arith.mulf %150, %154 : vector<2x32xf32>
    %157 = arith.addf %155, %156 : vector<2x32xf32>
    %158 = math.tanh %157 : vector<2x32xf32>
    %159 = arith.mulf %152, %158 : vector<2x32xf32>
    %c14 = arith.constant 14 : index
    %c0_33 = arith.constant 0 : index
    %160 = vector.load %arg10[%c14, %c0_33] : memref<16x32xf32, #tpu.memory_space<vmem>>, vector<2x32xf32>
    tpu.vector_store %arg10[%c14, %c0_33], %159 {strides = array<i32>} : memref<16x32xf32, #tpu.memory_space<vmem>>, vector<2x32xf32>,
    %c0_34 = arith.constant 0 : index
    %c0_35 = arith.constant 0 : index
    %161 = vector.load %arg8[%c0_34, %c0_35] : memref<2x32xf32, #tpu.memory_space<vmem>>, vector<2x32xf32>
    tpu.vector_store %arg8[%c0_34, %c0_35], %159 {strides = array<i32>} : memref<2x32xf32, #tpu.memory_space<vmem>>, vector<2x32xf32>,
    %c0_36 = arith.constant 0 : index
    %c0_37 = arith.constant 0 : index
    %162 = vector.load %arg9[%c0_36, %c0_37] : memref<2x32xf32, #tpu.memory_space<vmem>>, vector<2x32xf32>
    tpu.vector_store %arg9[%c0_36, %c0_37], %157 {strides = array<i32>} : memref<2x32xf32, #tpu.memory_space<vmem>>, vector<2x32xf32>,
    %c0_38 = arith.constant 0 : index
    %c0_39 = arith.constant 0 : index
    %163 = vector.load %arg10[%c0_38, %c0_39] : memref<16x32xf32, #tpu.memory_space<vmem>>, vector<16x32xf32>
    %cst_40 = arith.constant dense<0.000000e+00> : vector<16xf32>
    %164 = vector.multi_reduction <add>, %163, %cst_40 [1] : vector<16x32xf32> to vector<16xf32>
    %165 = vector.shape_cast %164 : vector<16xf32> to vector<16x1xf32>
    %cst_41 = arith.constant 3.200000e+01 : f32
    %166 = vector.broadcast %cst_41 : f32 to vector<16x1xf32>
    %167 = arith.divf %165, %166 : vector<16x1xf32>
    %168 = vector.broadcast %167 : vector<16x1xf32> to vector<16x32xf32>
    %169 = arith.subf %163, %168 : vector<16x32xf32>
    %170 = arith.mulf %169, %169 : vector<16x32xf32>
    %cst_42 = arith.constant dense<0.000000e+00> : vector<16xf32>
    %171 = vector.multi_reduction <add>, %170, %cst_42 [1] : vector<16x32xf32> to vector<16xf32>
    %172 = vector.shape_cast %171 : vector<16xf32> to vector<16x1xf32>
    %cst_43 = arith.constant 3.200000e+01 : f32
    %173 = vector.broadcast %cst_43 : f32 to vector<16x1xf32>
    %174 = arith.divf %172, %173 : vector<16x1xf32>
    %175 = vector.broadcast %167 : vector<16x1xf32> to vector<16x32xf32>
    %176 = arith.subf %163, %175 : vector<16x32xf32>
    %cst_44 = arith.constant 9.99999974E-6 : f32
    %177 = vector.broadcast %cst_44 : f32 to vector<16x1xf32>
    %178 = arith.addf %174, %177 : vector<16x1xf32>
    %179 = math.rsqrt %178 : vector<16x1xf32>
    %180 = vector.broadcast %179 : vector<16x1xf32> to vector<16x32xf32>
    %181 = arith.mulf %176, %180 : vector<16x32xf32>
    %c0_45 = arith.constant 0 : index
    %c0_46 = arith.constant 0 : index
    %182 = vector.load %arg5[%c0_45, %c0_46] : memref<1x32xf32, #tpu.memory_space<vmem>>, vector<1x32xf32>
    %183 = vector.broadcast %182 : vector<1x32xf32> to vector<16x32xf32>
    %184 = arith.mulf %181, %183 : vector<16x32xf32>
    %c0_47 = arith.constant 0 : index
    %c0_48 = arith.constant 0 : index
    %185 = vector.load %arg6[%c0_47, %c0_48] : memref<1x32xf32, #tpu.memory_space<vmem>>, vector<1x32xf32>
    %186 = vector.broadcast %185 : vector<1x32xf32> to vector<16x32xf32>
    %187 = arith.addf %184, %186 : vector<16x32xf32>
    %c0_49 = arith.constant 0 : index
    %c0_50 = arith.constant 0 : index
    %188 = vector.load %arg7[%c0_49, %c0_50] : memref<16x32xf32, #tpu.memory_space<vmem>>, vector<16x32xf32>
    tpu.vector_store %arg7[%c0_49, %c0_50], %187 {strides = array<i32>} : memref<16x32xf32, #tpu.memory_space<vmem>>, vector<16x32xf32>,
    return
  }
  func.func @transform_0(%arg0: i32) -> (i32, i32) {
    %c0_i32 = arith.constant 0 : i32
    %c0_i32_0 = arith.constant 0 : i32
    %c0_i32_1 = arith.constant 0 : i32
    return %c0_i32, %c0_i32_0 : i32, i32
  }
  func.func @transform_1(%arg0: i32) -> (i32, i32) {
    %c0_i32 = arith.constant 0 : i32
    %c0_i32_0 = arith.constant 0 : i32
    %c0_i32_1 = arith.constant 0 : i32
    return %c0_i32, %c0_i32_0 : i32, i32
  }
  func.func @transform_2(%arg0: i32) -> (i32, i32) {
    %c0_i32 = arith.constant 0 : i32
    %c0_i32_0 = arith.constant 0 : i32
    %c0_i32_1 = arith.constant 0 : i32
    return %c0_i32, %c0_i32_0 : i32, i32
  }
  func.func @transform_3(%arg0: i32) -> (i32, i32) {
    %c0_i32 = arith.constant 0 : i32
    %c0_i32_0 = arith.constant 0 : i32
    %c0_i32_1 = arith.constant 0 : i32
    return %c0_i32, %c0_i32_0 : i32, i32
  }
  func.func @transform_4(%arg0: i32) -> (i32, i32) {
    %c0_i32 = arith.constant 0 : i32
    %c0_i32_0 = arith.constant 0 : i32
    %c0_i32_1 = arith.constant 0 : i32
    return %c0_i32, %c0_i32_0 : i32, i32
  }
  func.func @transform_5(%arg0: i32) -> (i32, i32) {
    %c0_i32 = arith.constant 0 : i32
    %c0_i32_0 = arith.constant 0 : i32
    %c0_i32_1 = arith.constant 0 : i32
    return %c0_i32, %c0_i32_0 : i32, i32
  }
  func.func @transform_6(%arg0: i32) -> (i32, i32) {
    %c0_i32 = arith.constant 0 : i32
    %c0_i32_0 = arith.constant 0 : i32
    %c0_i32_1 = arith.constant 0 : i32
    return %c0_i32, %c0_i32_0 : i32, i32
  }
  func.func @transform_7(%arg0: i32) -> (i32, i32) {
    %c0_i32 = arith.constant 0 : i32
    %c0_i32_0 = arith.constant 0 : i32
    %c0_i32_1 = arith.constant 0 : i32
    return %c0_i32, %c0_i32_0 : i32, i32
  }
  func.func @transform_8(%arg0: i32) -> (i32, i32) {
    %c0_i32 = arith.constant 0 : i32
    %c0_i32_0 = arith.constant 0 : i32
    %c0_i32_1 = arith.constant 0 : i32
    return %c0_i32, %c0_i32_0 : i32, i32
  }
}

</mosaic_0001>

<bundles_post_ra>
// kernel: tpu_custom_call.1
= control target key start
LH: loop header
LB: loop body
LE: loop exit
PB: predicated region body
PF: predicated region fallthrough
CT: control target
= control target key end

     0   :  { %14 = vsyncpa [#allocation4], 0  ;;  %s1948_s0 = inlined_call_operand.hbm [shape: f32[16,128], index: 0, kind: input, shape index: {}]   ;;  %s1949_s1 = inlined_call_operand.hbm [shape: f32[128,128], index: 1, kind: input, shape index: {}]   ;;  %s1950_s2 = inlined_call_operand.vmem [shape: f32[1,128], index: 2, kind: input, shape index: {}]   ;;  %s1951_s3 = inlined_call_operand.hbm [shape: f32[32,128], index: 3, kind: input, shape index: {}]   ;;  %s1952_s4 = inlined_call_operand.vmem [shape: f32[1,32], index: 4, kind: input, shape index: {}]   ;;  %s1953_s5 = inlined_call_operand.vmem [shape: f32[1,32], index: 5, kind: input, shape index: {}]   ;;  %s1954_s6 = inlined_call_operand.hbm [shape: f32[16,32], index: 6, kind: output, shape index: {0}]   ;;  %s1955_s7 = inlined_call_operand.hbm [shape: f32[2,32], index: 7, kind: output, shape index: {1}]   ;;  %s1956_s8 = inlined_call_operand.hbm [shape: f32[2,32], index: 8, kind: output, shape index: {2}]  }
   0x1   :  { %15 = vsyncpa [#allocation7], 0 }
   0x2   :  { %16 = vsyncpa [#allocation5], 0 }
   0x3   :  { %17 = vsyncpa [#allocation11], 0  ;;  %s1650_s27 = smov [#allocation6]   ;;  %s1651_s29 = smov [#allocation3]  }
   0x4   :  { %s35_s28 = sshll.u32 %s1650_s27, 4  ;;  %s23_s30 = sshll.u32 %s1651_s29, 4  ;;  %s36_s28 = int_to_ptr.vmem [resolvable:$true] %s35_s28  ;;  %s1709_s30 = int_to_ptr.vmem [resolvable:$true] %s23_s30 }
   0x5   :  { %s1510_s11 = scalar_lea.hbm %s1949_s1, 2048 }
   0x6   :  { %p1511_p0 = scmp.ne.s32.totalorder %s1949_s1, %s1510_s11  ;;  %p1514_p1 = scmp.lt.u32.totalorder %s1510_s11, %s1949_s1 }
   0x8   :  { %p1516_p2 = pnand %p1514_p1, %p1511_p0 }
   0xa   :  { %1519 = shalt.err (!%p1516_p2)
}
   0xb   :  { %s1520_s16 = scalar_lea.vmem %s36_s28, 2048  ;;  %p1525_p4 = scmp.lt.s32.totalorder %s36_s28, %s36_s28 }
   0xc   :  { %p1521_p3 = scmp.ne.s32.totalorder %s36_s28, %s1520_s16  ;;  %p1526_p5 = scmp.lt.s32.totalorder %s1520_s16, %s1520_s16 }
   0xe   :  { %p1527_p6 = por %p1526_p5, %p1525_p4 }
  0x10   :  { %p1528_p7 = pnand %p1527_p6, %p1521_p3 }
  0x12   :  { %1531 = shalt.err (!%p1528_p7)
}
  0x13   :  { %s1652_s17 = smov 128   ;;  %s1653_s18 = smov 8  }
  0x14   :  { %41 = dma.hbm_to_vmem [thread:$0]  %s1949_s1, 2048, %s36_s28, [#allocation7], %s1652_s17, %s1652_s17, %s1653_s18  }
  0x15   :  { %s1532_s23 = scalar_lea.hbm %s1948_s0, 256 }
  0x16   :  { %p1533_p8 = scmp.ne.s32.totalorder %s1948_s0, %s1532_s23  ;;  %p1536_p9 = scmp.lt.u32.totalorder %s1532_s23, %s1948_s0 }
  0x18   :  { %p1538_p10 = pnand %p1536_p9, %p1533_p8 }
  0x1a   :  { %1541 = shalt.err (!%p1538_p10)
}
  0x1b   :  { %s1542_s29 = scalar_lea.vmem %s1709_s30, 256  ;;  %p1547_p12 = scmp.lt.s32.totalorder %s1709_s30, %s1709_s30 }
  0x1c   :  { %p1543_p11 = scmp.ne.s32.totalorder %s1709_s30, %s1542_s29  ;;  %p1548_p13 = scmp.lt.s32.totalorder %s1542_s29, %s1542_s29 }
  0x1e   :  { %p1549_p0 = por %p1548_p13, %p1547_p12 }
  0x20   :  { %p1550_p1 = pnand %p1549_p0, %p1543_p11 }
  0x22   :  { %1553 = shalt.err (!%p1550_p1)
}
  0x23   :  { %29 = dma.hbm_to_vmem [thread:$0]  %s1948_s0, 256, %s1709_s30, [#allocation4], %s1652_s17, %s1652_s17, %s1653_s18  }
  0x24   :  { %s1654_s9 = smov [#allocation8]   ;;  %s1554_s13 = scalar_lea.hbm %s1951_s3, 512 }
  0x25   :  { %s49_s10 = sshll.u32 %s1654_s9, 4  ;;  %p1555_p2 = scmp.ne.s32.totalorder %s1951_s3, %s1554_s13  ;;  %s50_s10 = int_to_ptr.vmem [resolvable:$true] %s49_s10 }
  0x26   :  { %p1558_p3 = scmp.lt.u32.totalorder %s1554_s13, %s1951_s3 }
  0x28   :  { %p1560_p4 = pnand %p1558_p3, %p1555_p2 }
  0x2a   :  { %1563 = shalt.err (!%p1560_p4)
}
  0x2b   :  { %s1564_s20 = scalar_lea.vmem %s50_s10, 512  ;;  %p1569_p6 = scmp.lt.s32.totalorder %s50_s10, %s50_s10 }
  0x2c   :  { %p1565_p5 = scmp.ne.s32.totalorder %s50_s10, %s1564_s20  ;;  %p1570_p7 = scmp.lt.s32.totalorder %s1564_s20, %s1564_s20 }
  0x2e   :  { %p1571_p8 = por %p1570_p7, %p1569_p6 }
  0x30   :  { %p1572_p9 = pnand %p1571_p8, %p1565_p5 }
  0x32   :  { %1575 = shalt.err (!%p1572_p9)
}
  0x33   :  { %55 = dma.hbm_to_vmem [thread:$0]  %s1951_s3, 512, %s50_s10, [#allocation7], %s1652_s17, %s1652_s17, %s1653_s18  }
  0x34   :  { %1642 = dma.done.wait [#allocation4], 256  }
  0x35   :  { %1643 = vsyncadd [#allocation4], 4294967040 }
  0x36   :  { %1644 = dma.done.wait [#allocation7], 2560  }
  0x37   :  { %1645 = vsyncadd [#allocation7], 4294964736  ;;  %v1655_v0 = vmov 0.0|0.0   ;;  %vm1656_vm0 = vmmov 0   ;;  %v1657_v1 = vmov 0.0   ;;  %v71_v2 = vld [vmem:[#allocation6] sm:$0xff] }
  0x38   :  { %1380 = vmatprep.subr.bf16.mxu1 %v1655_v0  ;;  %1268 = vmatprep.mubr.msk.f32.mxu1 %vm1656_vm0, %v1657_v1  ;;  %v72_v3 = vld [vmem:[#allocation6 + $0x8] sm:$0xff]  ;;  %v73_v4 = vld [vmem:[#allocation6 + $0x10] sm:$0xff]  ;;  %v74_v6 = vld [vmem:[#allocation6 + $0x18] sm:$0xff]  ;;  %s1658_s22 = smov 64   ;;  %vm276_vm1 = vcmask 254976   ;;  %vm173_vm2 = vcmask 261120  }
  0x39   :  { %v1348_v5 = vpack.c.bf16 %v72_v3, %v71_v2  ;;  %v1352_v7 = vpack.c.bf16 %v74_v6, %v73_v4  ;;  %v75_v8 = vld [vmem:[#allocation6 + $0x20] sm:$0xff]  ;;  %v76_v9 = vld [vmem:[#allocation6 + $0x28] sm:$0xff]  ;;  %v77_v12 = vld [vmem:[#allocation6 + $0x30] sm:$0xff]  ;;  %vm385_vm3 = vcmask 257026   ;;  %vm609_vm4 = vcmask 261126   ;;  %s1660_s23 = smov 96  }
  0x3a   :  { %v169_v10 = vld [vmem:[#allocation8] sm:$0xff]  ;;  %v1356_v11 = vpack.c.bf16 %v76_v9, %v75_v8  ;;  %v78_v13 = vld [vmem:[#allocation6 + $0x38] sm:$0xff]  ;;  %v170_v14 = vld [vmem:[#allocation8 + $0x8] sm:$0xff]  ;;  %vm497_vm5 = vcmask 259076   ;;  %s1661_s24 = smov [#allocation10]  }
  0x3b   :  { %1349 = vmatprep.subr.bf16.mxu0 %v1348_v5  ;;  %v1764_v15 = vpack.c.bf16 %v170_v14, %v169_v10  ;;  %v69_v16 = vld [vmem:[#allocation3] sm:$0xff]  ;;  %v172_v18 = vld [vmem:[#allocation8 + $0x18] sm:$0xff]  ;;  %v1360_v20 = vpack.c.bf16 %v78_v13, %v77_v12  ;;  %v79_v21 = vld [vmem:[#allocation6 + $0x40] sm:$0xff]  ;;  %s1122_s25 = sshll.u32 %s1661_s24, 4  ;;  %s1123_s25 = int_to_ptr.vmem [resolvable:$true] %s1122_s25 }
  0x3c   :  { %1351 = vmatpush3.bf16.msra.mxu0 %v1348_v5  ;;  %v171_v17 = vld [vmem:[#allocation8 + $0x10] sm:$0xff]  ;;  %1257 = vmatprep.mubr.f32.mxu0 %v69_v16  ;;  %v80_v22 = vld [vmem:[#allocation6 + $0x48] sm:$0xff]  ;;  %v82_v25 = vld [vmem:[#allocation6 + $0x58] sm:$0xff]  ;;  %s1576_s26 = scalar_lea.vmem %s1123_s25, 32  ;;  %p1581_p11 = scmp.lt.s32.totalorder %s1123_s25, %s1123_s25 }
  0x3d   :  { %1353 = vmatprep.subr.bf16.mxu0 %v1352_v7  ;;  %1382 = vmatpush3.bf16.msra.mxu1 %v1764_v15  ;;  %v1767_v19 = vpack.c.bf16 %v172_v18, %v171_v17  ;;  %v1364_v23 = vpack.c.bf16 %v80_v22, %v79_v21  ;;  %v81_v24 = vld [vmem:[#allocation6 + $0x50] sm:$0xff]  ;;  %v83_v27 = vld [vmem:[#allocation6 + $0x60] sm:$0xff]  ;;  %v84_v28 = vld [vmem:[#allocation6 + $0x68] sm:$0xff]  ;;  %p1577_p10 = scmp.ne.s32.totalorder %s1123_s25, %s1576_s26  ;;  %p1582_p12 = scmp.lt.s32.totalorder %s1576_s26, %s1576_s26 }
  0x3e   :  { %1383 = vmatprep.subr.bf16.mxu1 %v1655_v0  ;;  %v1368_v26 = vpack.c.bf16 %v82_v25, %v81_v24  ;;  %v1372_v29 = vpack.c.bf16 %v84_v28, %v83_v27  ;;  %v85_v30 = vld [vmem:[#allocation6 + $0x70] sm:$0xff]  ;;  %v86_v31 = vld [vmem:[#allocation6 + $0x78] sm:$0xff]  ;;  %v1149_v36 = vld [vmem:[%s1950_s2] ss:$0 sm:$0xff]  ;;  %s1659_s2 = smov 32  }
  0x3f   :  { %v1376_v32 = vpack.c.bf16 %v86_v31, %v85_v30  ;;  %v70_v33 = vld [vmem:[#allocation3 + $0x8] sm:$0xff]  ;;  %p1583_p13 = por %p1582_p12, %p1581_p11 }
  0x40   :  { %1355 = vmatpush3.bf16.msra.mxu0 %v1352_v7 }
  0x41   :  { %1357 = vmatprep.subr.bf16.mxu0 %v1356_v11  ;;  %1385 = vmatpush3.bf16.msra.mxu1 %v1767_v19  ;;  %p1584_p0 = pnand %p1583_p13, %p1577_p10 }
  0x42   :  { %1386 = vmatprep.subr.bf16.mxu1 %v1655_v0 }
  0x44   :  { %1359 = vmatpush3.bf16.msra.mxu0 %v1356_v11  ;;  %1269 = vmatmul.mubr.f32.vlgmr.msra.gmra.mrb[0].mxu1 %v1657_v1 }
  0x45   :  { %1361 = vmatprep.subr.bf16.mxu0 %v1360_v20  ;;  %1388 = vmatpush3.bf16.msra.mxu1 %v1764_v15 }
  0x46   :  { %1389 = vmatprep.subr.bf16.mxu1 %v1655_v0  ;;  %1279 = vmatprep.mubr.msk.f32.mxu1 %vm1656_vm0, %v1657_v1 }
  0x48   :  { %1363 = vmatpush3.bf16.msra.mxu0 %v1360_v20 }
  0x49   :  { %1365 = vmatprep.subr.bf16.mxu0 %v1364_v23  ;;  %1391 = vmatpush3.bf16.msra.mxu1 %v1767_v19 }
  0x4a   :  { %1392 = vmatprep.subr.bf16.mxu1 %v1655_v0 }
  0x4c   :  { %1367 = vmatpush3.bf16.msra.mxu0 %v1364_v23 }
  0x4d   :  { %1369 = vmatprep.subr.bf16.mxu0 %v1368_v26 }
  0x50   :  { %1371 = vmatpush3.bf16.msra.mxu0 %v1368_v26 }
  0x51   :  { %1373 = vmatprep.subr.bf16.mxu0 %v1372_v29 }
  0x54   :  { %1375 = vmatpush3.bf16.msra.mxu0 %v1372_v29 }
  0x55   :  { %1377 = vmatprep.subr.bf16.mxu0 %v1376_v32 }
  0x58   :  { %1379 = vmatpush3.bf16.msra.mxu0 %v1376_v32 }
  0x59   :  { %1404 = vmatprep.subr.bf16.mxu0 %v1655_v0 }
  0x5b   :  { %1258 = vmatmul.mubr.f32.vlgmr.msra.gmra.mrb[0].mxu0 %v70_v33 }
  0x5c   :  { %1406 = vmatpush3.bf16.msra.mxu0 %v1764_v15  ;;  %1312 = vmatprep.mubr.msk.f32.mxu0 %vm1656_vm0, %v1657_v1 }
  0x5d   :  { %1407 = vmatprep.subr.bf16.mxu0 %v1655_v0 }
  0x60   :  { %1409 = vmatpush3.bf16.msra.mxu0 %v1767_v19 }
  0x61   :  { %1416 = vmatprep.subr.bf16.mxu0 %v1655_v0 }
 0x117   :  { %v243_v34 = vpop.f32.mrb[0].mxu1 }
 0x118   :  { %v1270_v35 = vpop.f32.mrb[1].mxu1 }
 0x12e   :  { %v1259_v37 = vpop.f32.mrb[0].mxu0 }
 0x12f   :  { %v1789_v38 = vadd.f32 %v1259_v37, %v1149_v36  ;;  %v160_v39 = vpop.f32.mrb[1].mxu0 }
 0x130   :  { %v1791_v40 = vadd.f32 %v1149_v36, %v160_v39 }
 0x132   :  { %v247_v41 = vadd.f32 %v243_v34, %v1791_v40 }
 0x134   :  { %1442 = vtanh.f32 %v247_v41  ;;  %v1150_v43 = vmul.f32 -1.442695, %v247_v41 }
 0x136   :  { %1444 = vpow2.f32 %v1150_v43 }
 0x13e   :  { %v1443_v42 = vpop.eup %1442 }
 0x13f   :  { %257 = vrot.lane.b32.xlu0 %v1443_v42, %s1658_s22 }
 0x140   :  { %v1445_v44 = vpop.eup %1444 }
 0x141   :  { %v251_v45 = vadd.f32 1.0, %v1445_v44 }
 0x143   :  { %1446 = vrcp.f32 %v251_v45 }
 0x14d   :  { %v1447_v46 = vpop.eup %1446 }
 0x14e   :  { %v255_v49 = vmul.f32 0.0, %v1447_v46 }
 0x1b1   :  { %v258_v47 = vpop.permute.xlu0 %257 }
 0x1b2   :  { %v260_v48 = vmul.f32 %v1447_v46, %v258_v47 }
 0x1b4   :  { %262 = vrot.lane.b32.xlu0 %v260_v48, %s1659_s2 }
 0x226   :  { %v263_v50 = vpop.permute.xlu0 %262 }
 0x227   :  { %v265_v51 = vadd.f32 %v263_v50, %v255_v49 }
 0x229   :  { %1448 = vtanh.f32 %v265_v51  ;;  %v362_v5 = vrot.slane %v265_v51, 6 }
 0x233   :  { %v1449_v52 = vpop.eup %1448 }
 0x234   :  { %268 = vrot.lane.b32.xlu1 %v1449_v52, %s1658_s22 }
 0x2a6   :  { %v269_v53 = vpop.permute.xlu1 %268 }
 0x2a7   :  { %v271_v54 = vmul.f32 %v1447_v46, %v269_v53 }
 0x2a9   :  { %273 = vrot.lane.b32.xlu1 %v271_v54, %s1659_s2 }
 0x31b   :  { %v274_v55 = vpop.permute.xlu1 %273 }
 0x31c   :  { %277 = vst.msk [vmem:[#allocation2] sm:$0x3] %vm276_vm1, %v274_v55  ;;  %1280 = vmatmul.mubr.msk.f32.vlgmr.msra.gmra.mrb[2].mxu1 %vm173_vm2, %v274_v55 }
 0x31d   :  { %1394 = vmatpush3.bf16.msra.mxu1 %v1764_v15  ;;  %1290 = vmatprep.mubr.msk.f32.mxu1 %vm1656_vm0, %v1657_v1 }
 0x31e   :  { %1395 = vmatprep.subr.bf16.mxu1 %v1655_v0 }
 0x321   :  { %1397 = vmatpush3.bf16.msra.mxu1 %v1767_v19 }
 0x322   :  { %1398 = vmatprep.subr.bf16.mxu1 %v1655_v0 }
 0x3ef   :  { %v346_v56 = vpop.f32.mrb[2].mxu1 }
 0x3f0   :  { %v351_v57 = vrot.slane %v346_v56, 6  ;;  %v1281_v58 = vpop.f32.mrb[3].mxu1 }
 0x3f2   :  { %v353_v59 = vadd.f32 %v351_v57, %v1791_v40 }
 0x3f4   :  { %1450 = vtanh.f32 %v353_v59  ;;  %v1152_v61 = vmul.f32 -1.442695, %v353_v59 }
 0x3f6   :  { %1452 = vpow2.f32 %v1152_v61 }
 0x3fe   :  { %v1451_v60 = vpop.eup %1450 }
 0x3ff   :  { %366 = vrot.lane.b32.xlu0 %v1451_v60, %s1658_s22 }
 0x400   :  { %v1453_v62 = vpop.eup %1452 }
 0x401   :  { %v357_v63 = vadd.f32 1.0, %v1453_v62 }
 0x403   :  { %1454 = vrcp.f32 %v357_v63 }
 0x40d   :  { %v1455_v2 = vpop.eup %1454 }
 0x40e   :  { %v364_v6 = vmul.f32 %v1455_v2, %v362_v5 }
 0x471   :  { %v367_v3 = vpop.permute.xlu0 %366 }
 0x472   :  { %v369_v4 = vmul.f32 %v1455_v2, %v367_v3 }
 0x474   :  { %371 = vrot.lane.b32.xlu1 %v369_v4, %s1659_s2 }
 0x4e6   :  { %v372_v7 = vpop.permute.xlu1 %371 }
 0x4e7   :  { %v374_v8 = vadd.f32 %v372_v7, %v364_v6 }
 0x4e9   :  { %1456 = vtanh.f32 %v374_v8  ;;  %v474_v27 = vrot.slane %v374_v8, 6 }
 0x4f3   :  { %v1457_v9 = vpop.eup %1456 }
 0x4f4   :  { %377 = vrot.lane.b32.xlu0 %v1457_v9, %s1658_s22 }
 0x566   :  { %v378_v10 = vpop.permute.xlu0 %377 }
 0x567   :  { %v1810_v11 = vmul.f32 %v1455_v2, %v378_v10 }
 0x569   :  { %v387_v12 = vrot.slane %v1810_v11, 2 }
 0x56b   :  { %388 = vrot.lane.b32.xlu1 %v387_v12, %s1659_s2 }
 0x5dd   :  { %v389_v13 = vpop.permute.xlu1 %388 }
 0x5de   :  { %1291 = vmatmul.mubr.msk.f32.vlgmr.msra.gmra.mrb[4].mxu1 %vm173_vm2, %v389_v13 }
 0x5df   :  { %1400 = vmatpush3.bf16.msra.mxu1 %v1764_v15  ;;  %1301 = vmatprep.mubr.msk.f32.mxu1 %vm1656_vm0, %v1657_v1 }
 0x5e0   :  { %1401 = vmatprep.subr.bf16.mxu1 %v1655_v0 }
 0x5e3   :  { %1403 = vmatpush3.bf16.msra.mxu1 %v1767_v19 }
 0x5e4   :  { %1410 = vmatprep.subr.bf16.mxu1 %v1655_v0 }
 0x6b1   :  { %v458_v14 = vpop.f32.mrb[4].mxu1 }
 0x6b2   :  { %v463_v16 = vrot.slane %v458_v14, 4  ;;  %v1292_v17 = vpop.f32.mrb[5].mxu1 }
 0x6b4   :  { %v465_v18 = vadd.f32 %v463_v16, %v1791_v40 }
 0x6b6   :  { %1458 = vtanh.f32 %v465_v18  ;;  %v1154_v21 = vmul.f32 -1.442695, %v465_v18 }
 0x6b8   :  { %1460 = vpow2.f32 %v1154_v21 }
 0x6c0   :  { %v1459_v20 = vpop.eup %1458 }
 0x6c1   :  { %478 = vrot.lane.b32.xlu0 %v1459_v20, %s1658_s22 }
 0x6c2   :  { %v1461_v22 = vpop.eup %1460 }
 0x6c3   :  { %v469_v23 = vadd.f32 1.0, %v1461_v22 }
 0x6c5   :  { %1462 = vrcp.f32 %v469_v23 }
 0x6cf   :  { %v1463_v24 = vpop.eup %1462 }
 0x6d0   :  { %v476_v28 = vmul.f32 %v1463_v24, %v474_v27 }
 0x733   :  { %v479_v25 = vpop.permute.xlu0 %478 }
 0x734   :  { %v481_v26 = vmul.f32 %v1463_v24, %v479_v25 }
 0x736   :  { %483 = vrot.lane.b32.xlu1 %v481_v26, %s1659_s2 }
 0x7a8   :  { %v484_v29 = vpop.permute.xlu1 %483 }
 0x7a9   :  { %v486_v30 = vadd.f32 %v484_v29, %v476_v28 }
 0x7ab   :  { %1464 = vtanh.f32 %v486_v30  ;;  %v586_v49 = vrot.slane %v486_v30, 6 }
 0x7b5   :  { %v1465_v31 = vpop.eup %1464 }
 0x7b6   :  { %489 = vrot.lane.b32.xlu0 %v1465_v31, %s1658_s22 }
 0x828   :  { %v490_v32 = vpop.permute.xlu0 %489 }
 0x829   :  { %v1825_v33 = vmul.f32 %v1463_v24, %v490_v32 }
 0x82b   :  { %v499_v34 = vrot.slane %v1825_v33, 4 }
 0x82d   :  { %500 = vrot.lane.b32.xlu1 %v499_v34, %s1659_s2 }
 0x89f   :  { %v501_v35 = vpop.permute.xlu1 %500 }
 0x8a0   :  { %1302 = vmatmul.mubr.msk.f32.vlgmr.msra.gmra.mrb[6].mxu1 %vm173_vm2, %v501_v35 }
 0x8a1   :  { %1412 = vmatpush3.bf16.msra.mxu1 %v1764_v15  ;;  %1323 = vmatprep.mubr.msk.f32.mxu1 %vm1656_vm0, %v1657_v1 }
 0x8a2   :  { %1413 = vmatprep.subr.bf16.mxu1 %v1655_v0 }
 0x8a5   :  { %1415 = vmatpush3.bf16.msra.mxu1 %v1767_v19 }
 0x8a6   :  { %1422 = vmatprep.subr.bf16.mxu1 %v1655_v0 }
 0x973   :  { %v570_v36 = vpop.f32.mrb[6].mxu1 }
 0x974   :  { %v575_v37 = vrot.slane %v570_v36, 2  ;;  %v1303_v39 = vpop.f32.mrb[7].mxu1 }
 0x976   :  { %v577_v41 = vadd.f32 %v575_v37, %v1791_v40 }
 0x978   :  { %1466 = vtanh.f32 %v577_v41  ;;  %v1156_v43 = vmul.f32 -1.442695, %v577_v41 }
 0x97a   :  { %1468 = vpow2.f32 %v1156_v43 }
 0x982   :  { %v1467_v42 = vpop.eup %1466 }
 0x983   :  { %590 = vrot.lane.b32.xlu0 %v1467_v42, %s1658_s22 }
 0x984   :  { %v1469_v44 = vpop.eup %1468 }
 0x985   :  { %v581_v45 = vadd.f32 1.0, %v1469_v44 }
 0x987   :  { %1470 = vrcp.f32 %v581_v45 }
 0x991   :  { %v1471_v46 = vpop.eup %1470 }
 0x992   :  { %v588_v50 = vmul.f32 %v1471_v46, %v586_v49 }
 0x9f5   :  { %v591_v47 = vpop.permute.xlu0 %590 }
 0x9f6   :  { %v593_v48 = vmul.f32 %v1471_v46, %v591_v47 }
 0x9f8   :  { %595 = vrot.lane.b32.xlu1 %v593_v48, %s1659_s2 }
 0xa6a   :  { %v596_v51 = vpop.permute.xlu1 %595 }
 0xa6b   :  { %v598_v52 = vadd.f32 %v596_v51, %v588_v50 }
 0xa6d   :  { %1472 = vtanh.f32 %v598_v52  ;;  %v695_v5 = vrot.slane %v598_v52, 6 }
 0xa77   :  { %v1473_v40 = vpop.eup %1472 }
 0xa78   :  { %601 = vrot.lane.b32.xlu0 %v1473_v40, %s1658_s22 }
 0xaea   :  { %v602_v53 = vpop.permute.xlu0 %601 }
 0xaeb   :  { %v1840_v54 = vmul.f32 %v1471_v46, %v602_v53 }
 0xaed   :  { %v611_v55 = vrot.slane %v1840_v54, 6 }
 0xaef   :  { %612 = vrot.lane.b32.xlu1 %v611_v55, %s1659_s2 }
 0xb61   :  { %v613_v56 = vpop.permute.xlu1 %612 }
 0xb62   :  { %1313 = vmatmul.mubr.msk.f32.vlgmr.msra.gmra.mrb[2].mxu0 %vm173_vm2, %v613_v56 }
 0xb63   :  { %1418 = vmatpush3.bf16.msra.mxu0 %v1764_v15  ;;  %1334 = vmatprep.mubr.msk.f32.mxu0 %vm1656_vm0, %v1657_v1 }
 0xb64   :  { %1419 = vmatprep.subr.bf16.mxu0 %v1655_v0 }
 0xb67   :  { %1421 = vmatpush3.bf16.msra.mxu0 %v1767_v19 }
 0xc35   :  { %v682_v57 = vpop.f32.mrb[2].mxu0 }
 0xc36   :  { %v686_v58 = vadd.f32 %v682_v57, %v1789_v38  ;;  %v1314_v59 = vpop.f32.mrb[3].mxu0 }
 0xc38   :  { %1474 = vtanh.f32 %v686_v58  ;;  %v1158_v61 = vmul.f32 -1.442695, %v686_v58 }
 0xc3a   :  { %1476 = vpow2.f32 %v1158_v61 }
 0xc42   :  { %v1475_v60 = vpop.eup %1474 }
 0xc43   :  { %699 = vrot.lane.b32.xlu0 %v1475_v60, %s1658_s22 }
 0xc44   :  { %v1477_v62 = vpop.eup %1476 }
 0xc45   :  { %v690_v63 = vadd.f32 1.0, %v1477_v62 }
 0xc47   :  { %1478 = vrcp.f32 %v690_v63 }
 0xc51   :  { %v1479_v2 = vpop.eup %1478 }
 0xc52   :  { %v697_v6 = vmul.f32 %v1479_v2, %v695_v5 }
 0xcb5   :  { %v700_v3 = vpop.permute.xlu0 %699 }
 0xcb6   :  { %v702_v4 = vmul.f32 %v1479_v2, %v700_v3 }
 0xcb8   :  { %704 = vrot.lane.b32.xlu1 %v702_v4, %s1659_s2 }
 0xd2a   :  { %v705_v7 = vpop.permute.xlu1 %704 }
 0xd2b   :  { %v707_v8 = vadd.f32 %v705_v7, %v697_v6 }
 0xd2d   :  { %1480 = vtanh.f32 %v707_v8 }
 0xd37   :  { %v1481_v9 = vpop.eup %1480 }
 0xd38   :  { %710 = vrot.lane.b32.xlu0 %v1481_v9, %s1658_s22 }
 0xdaa   :  { %v711_v10 = vpop.permute.xlu0 %710 }
 0xdab   :  { %v713_v12 = vmul.f32 %v1479_v2, %v711_v10 }
 0xdad   :  { %715 = vrot.lane.b32.xlu1 %v713_v12, %s1659_s2 }
 0xe1f   :  { %v716_v13 = vpop.permute.xlu1 %715 }
 0xe20   :  { %718 = vst.msk [vmem:[#allocation2 + $0x8] sm:$0x3] %vm276_vm1, %v716_v13  ;;  %1324 = vmatmul.mubr.msk.f32.vlgmr.msra.gmra.mrb[8].mxu1 %vm173_vm2, %v716_v13 }
 0xe21   :  { %1424 = vmatpush3.bf16.msra.mxu1 %v1764_v15  ;;  %1345 = vmatprep.mubr.msk.f32.mxu1 %vm1656_vm0, %v1657_v1 }
 0xe22   :  { %1425 = vmatprep.subr.bf16.mxu1 %v1655_v0  ;;  %v803_v0 = vrot.slane %v707_v8, 6 }
 0xe25   :  { %1427 = vmatpush3.bf16.msra.mxu1 %v1767_v19 }
 0xef3   :  { %v787_v14 = vpop.f32.mrb[8].mxu1 }
 0xef4   :  { %v792_v16 = vrot.slane %v787_v14, 6  ;;  %v1325_v17 = vpop.f32.mrb[9].mxu1 }
 0xef6   :  { %v794_v18 = vadd.f32 %v792_v16, %v1789_v38 }
 0xef8   :  { %1482 = vtanh.f32 %v794_v18  ;;  %v1160_v21 = vmul.f32 -1.442695, %v794_v18 }
 0xefa   :  { %1484 = vpow2.f32 %v1160_v21 }
 0xf02   :  { %v1483_v20 = vpop.eup %1482 }
 0xf03   :  { %807 = vrot.lane.b32.xlu0 %v1483_v20, %s1658_s22 }
 0xf04   :  { %v1485_v22 = vpop.eup %1484 }
 0xf05   :  { %v798_v15 = vadd.f32 1.0, %v1485_v22 }
 0xf07   :  { %1486 = vrcp.f32 %v798_v15 }
 0xf11   :  { %v1487_v23 = vpop.eup %1486 }
 0xf12   :  { %v805_v19 = vmul.f32 %v1487_v23, %v803_v0 }
 0xf75   :  { %v808_v1 = vpop.permute.xlu0 %807 }
 0xf76   :  { %v810_v24 = vmul.f32 %v1487_v23, %v808_v1 }
 0xf78   :  { %812 = vrot.lane.b32.xlu1 %v810_v24, %s1659_s2 }
 0xfea   :  { %v813_v25 = vpop.permute.xlu1 %812 }
 0xfeb   :  { %v815_v26 = vadd.f32 %v813_v25, %v805_v19 }
 0xfed   :  { %1488 = vtanh.f32 %v815_v26  ;;  %v914_v46 = vrot.slane %v815_v26, 6 }
 0xff7   :  { %v1489_v27 = vpop.eup %1488 }
 0xff8   :  { %818 = vrot.lane.b32.xlu0 %v1489_v27, %s1658_s22 }
0x106a   :  { %v819_v28 = vpop.permute.xlu0 %818 }
0x106b   :  { %v1866_v29 = vmul.f32 %v1487_v23, %v819_v28 }
0x106d   :  { %v827_v30 = vrot.slane %v1866_v29, 2 }
0x106f   :  { %828 = vrot.lane.b32.xlu1 %v827_v30, %s1659_s2 }
0x10e1   :  { %v829_v31 = vpop.permute.xlu1 %828 }
0x10e2   :  { %1335 = vmatmul.mubr.msk.f32.vlgmr.msra.gmra.mrb[4].mxu0 %vm173_vm2, %v829_v31 }
0x11b5   :  { %v898_v32 = vpop.f32.mrb[4].mxu0 }
0x11b6   :  { %v903_v34 = vrot.slane %v898_v32, 4  ;;  %v1336_v35 = vpop.f32.mrb[5].mxu0 }
0x11b8   :  { %v905_v36 = vadd.f32 %v903_v34, %v1789_v38 }
0x11ba   :  { %1490 = vtanh.f32 %v905_v36  ;;  %v1162_v39 = vmul.f32 -1.442695, %v905_v36 }
0x11bc   :  { %1492 = vpow2.f32 %v1162_v39 }
0x11c4   :  { %v1491_v37 = vpop.eup %1490 }
0x11c5   :  { %918 = vrot.lane.b32.xlu0 %v1491_v37, %s1658_s22 }
0x11c6   :  { %v1493_v41 = vpop.eup %1492 }
0x11c7   :  { %v909_v42 = vadd.f32 1.0, %v1493_v41 }
0x11c9   :  { %1494 = vrcp.f32 %v909_v42 }
0x11d3   :  { %v1495_v43 = vpop.eup %1494 }
0x11d4   :  { %v916_v47 = vmul.f32 %v1495_v43, %v914_v46 }
0x1237   :  { %v919_v44 = vpop.permute.xlu0 %918 }
0x1238   :  { %v921_v45 = vmul.f32 %v1495_v43, %v919_v44 }
0x123a   :  { %923 = vrot.lane.b32.xlu1 %v921_v45, %s1659_s2 }
0x12ac   :  { %v924_v48 = vpop.permute.xlu1 %923 }
0x12ad   :  { %v926_v49 = vadd.f32 %v924_v48, %v916_v47 }
0x12af   :  { %1496 = vtanh.f32 %v926_v49 }
0x12b9   :  { %v1497_v50 = vpop.eup %1496 }
0x12ba   :  { %929 = vrot.lane.b32.xlu0 %v1497_v50, %s1658_s22 }
0x132c   :  { %v930_v51 = vpop.permute.xlu0 %929 }
0x132d   :  { %v932_v52 = vmul.f32 %v1495_v43, %v930_v51 }
0x132f   :  { %v938_v40 = vrot.slane %v932_v52, 4 }
0x1331   :  { %939 = vrot.lane.b32.xlu1 %v938_v40, %s1659_s2 }
0x13a3   :  { %v940_v53 = vpop.permute.xlu1 %939 }
0x13a4   :  { %1346 = vmatmul.mubr.msk.f32.vlgmr.msra.gmra.mrb[10].mxu1 %vm173_vm2, %v940_v53 }
0x1477   :  { %v1009_v55 = vpop.f32.mrb[10].mxu1 }
0x1478   :  { %v1014_v56 = vrot.slane %v1009_v55, 2  ;;  %v1347_v57 = vpop.f32.mrb[11].mxu1 }
0x147a   :  { %v1016_v58 = vadd.f32 %v1014_v56, %v1789_v38  ;;  %v1025_v38 = vrot.slane %v926_v49, 6 }
0x147c   :  { %1498 = vtanh.f32 %v1016_v58  ;;  %v1164_v60 = vmul.f32 -1.442695, %v1016_v58 }
0x147e   :  { %1500 = vpow2.f32 %v1164_v60 }
0x1486   :  { %v1499_v59 = vpop.eup %1498 }
0x1487   :  { %1029 = vrot.lane.b32.xlu0 %v1499_v59, %s1658_s22 }
0x1488   :  { %v1501_v61 = vpop.eup %1500 }
0x1489   :  { %v1020_v62 = vadd.f32 1.0, %v1501_v61 }
0x148b   :  { %1502 = vrcp.f32 %v1020_v62 }
0x1495   :  { %v1503_v63 = vpop.eup %1502 }
0x1496   :  { %v1027_v4 = vmul.f32 %v1503_v63, %v1025_v38 }
0x14f9   :  { %v1030_v2 = vpop.permute.xlu0 %1029 }
0x14fa   :  { %v1032_v3 = vmul.f32 %v1503_v63, %v1030_v2 }
0x14fc   :  { %1034 = vrot.lane.b32.xlu1 %v1032_v3, %s1659_s2 }
0x1500   :  { %382 = vrot.lane.b32.xlu1 %v1810_v11, %s1659_s2 }
0x1504   :  { %606 = vrot.lane.b32.xlu1 %v1840_v54, %s1659_s2 }
0x1508   :  { %934 = vrot.lane.b32.xlu1 %v932_v52, %s1659_s2 }
0x156e   :  { %v1035_v5 = vpop.permute.xlu1 %1034 }
0x156f   :  { %v1037_v6 = vadd.f32 %v1035_v5, %v1027_v4 }
0x1571   :  { %1504 = vtanh.f32 %v1037_v6 }
0x1572   :  { %v383_v7 = vpop.permute.xlu1 %382 }
0x1573   :  { %386 = vst.msk [vmem:[#allocation2] sm:$0xc] %vm385_vm3, %v383_v7 }
0x1576   :  { %v607_v8 = vpop.permute.xlu1 %606 }
0x1577   :  { %610 = vst.msk [vmem:[#allocation2] sm:$0xc0] %vm609_vm4, %v607_v8 }
0x157a   :  { %v935_v11 = vpop.permute.xlu1 %934 }
0x157b   :  { %v1505_v9 = vpop.eup %1504  ;;  %937 = vst.msk [vmem:[#allocation2 + $0x8] sm:$0x30] %vm497_vm5, %v935_v11 }
0x157c   :  { %1040 = vrot.lane.b32.xlu0 %v1505_v9, %s1658_s22 }
0x1580   :  { %494 = vrot.lane.b32.xlu0 %v1825_v33, %s1659_s2 }
0x1584   :  { %823 = vrot.lane.b32.xlu0 %v1866_v29, %s1659_s2 }
0x15ee   :  { %v1041_v54 = vpop.permute.xlu0 %1040 }
0x15ef   :  { %v1043_v10 = vmul.f32 %v1503_v63, %v1041_v54 }
0x15f1   :  { %1045 = vrot.lane.b32.xlu0 %v1043_v10, %s1659_s2 }
0x15f2   :  { %v495_v12 = vpop.permute.xlu0 %494 }
0x15f3   :  { %498 = vst.msk [vmem:[#allocation2] sm:$0x30] %vm497_vm5, %v495_v12 }
0x15f6   :  { %v824_v13 = vpop.permute.xlu0 %823 }
0x15f7   :  { %826 = vst.msk [vmem:[#allocation2 + $0x8] sm:$0xc] %vm385_vm3, %v824_v13 }
0x15fa   :  { %v1055_v14 = vld [vmem:[#allocation2] sm:$0xff] }
0x15fb   :  { %v1057_v16 = vsel %vm173_vm2, %v1055_v14, 0.0 }
0x15fc   :  { %1058 = vadd.xlane.f32.xlu1 %v1057_v16 }
0x1663   :  { %v1046_v17 = vpop.permute.xlu0 %1045 }
0x1664   :  { %1048 = vst.msk [vmem:[#allocation2 + $0x8] sm:$0xc0] %vm609_vm4, %v1046_v17  ;;  %1049 = vst.msk [vmem:[#allocation10 - $0x6] sm:$0xc0] %vm609_vm4, %v1046_v17 }
0x166b   :  { %v1056_v33 = vld [vmem:[#allocation2 + $0x8] sm:$0xff] }
0x166c   :  { %v1060_v18 = vsel %vm173_vm2, %v1056_v33, 0.0 }
0x166d   :  { %1061 = vadd.xlane.f32.xlu0 %v1060_v18 }
0x1689   :  { %v1059_v20 = vpop.xlane.xlu1 %1058 }
0x168a   :  { %v1064_v21 = vmul.f32 0.03125, %v1059_v20 }
0x168c   :  { %v1066_v22 = vsub.f32 %v1055_v14, %v1064_v21 }
0x168e   :  { %v1068_v15 = vmul.f32 %v1066_v22, %v1066_v22 }
0x1690   :  { %v1070_v23 = vsel %vm173_vm2, %v1068_v15, 0.0 }
0x1691   :  { %1071 = vadd.xlane.f32.xlu0 %v1070_v23 }
0x16a7   :  { %1051 = vrot.lane.b32.xlu0 %v1037_v6, %s1660_s23 }
0x16fa   :  { %v1062_v1 = vpop.xlane.xlu0 %1061 }
0x16fb   :  { %v1065_v24 = vmul.f32 0.03125, %v1062_v1 }
0x16fd   :  { %v1067_v0 = vsub.f32 %v1056_v33, %v1065_v24 }
0x16ff   :  { %v1069_v19 = vmul.f32 %v1067_v0, %v1067_v0 }
0x1701   :  { %v1073_v25 = vsel %vm173_vm2, %v1069_v19, 0.0 }
0x1702   :  { %1074 = vadd.xlane.f32.xlu1 %v1073_v25 }
0x171e   :  { %v1072_v26 = vpop.xlane.xlu0 %1071 }
0x171f   :  { %v1076_v27 = vmul.f32 0.03125, %v1072_v26 }
0x1721   :  { %v1078_v28 = vadd.f32 1e-05, %v1076_v27 }
0x1722   :  { %v1052_v29 = vpop.permute.xlu0 %1051 }
0x1723   :  { %1587 = shalt.err (!%p1584_p0)
}
0x1724   :  { %s1588_s1 = scalar_lea.hbm %s1955_s7, 32 }
0x1725   :  { %p1589_p1 = scmp.ne.s32.totalorder %s1955_s7, %s1588_s1  ;;  %p1592_p2 = scmp.lt.u32.totalorder %s1588_s1, %s1955_s7 }
0x1727   :  { %p1594_p3 = pnand %p1592_p2, %p1589_p1 }
0x1729   :  { %1597 = shalt.err (!%p1594_p3)
}
0x172a   :  { %1125 = dma.vmem_to_hbm [thread:$0]  %s1123_s25, 32, %s1955_s7, [#allocation11]   ;;  %1506 = vrsqrt.f32 %v1078_v28  ;;  %1054 = vst.msk [vmem:[#allocation12 - $0x6] sm:$0xc0] %vm609_vm4, %v1052_v29 }
0x172b   :  { %s1662_s14 = smov [#allocation12]  }
0x172c   :  { %s1132_s15 = sshll.u32 %s1662_s14, 4  ;;  %s1133_s15 = int_to_ptr.vmem [resolvable:$true] %s1132_s15 }
0x172d   :  { %s1598_s16 = scalar_lea.vmem %s1133_s15, 32  ;;  %p1603_p5 = scmp.lt.s32.totalorder %s1133_s15, %s1133_s15 }
0x172e   :  { %p1599_p4 = scmp.ne.s32.totalorder %s1133_s15, %s1598_s16  ;;  %p1604_p6 = scmp.lt.s32.totalorder %s1598_s16, %s1598_s16 }
0x1730   :  { %p1605_p7 = por %p1604_p6, %p1603_p5 }
0x1732   :  { %p1606_p8 = pnand %p1605_p7, %p1599_p4 }
0x1734   :  { %1609 = shalt.err (!%p1606_p8)
}
0x1735   :  { %s1610_s0 = scalar_lea.hbm %s1956_s8, 32 }
0x1736   :  { %p1611_p9 = scmp.ne.s32.totalorder %s1956_s8, %s1610_s0  ;;  %p1614_p10 = scmp.lt.u32.totalorder %s1610_s0, %s1956_s8 }
0x1738   :  { %p1616_p11 = pnand %p1614_p10, %p1611_p9 }
0x173a   :  { %1619 = shalt.err (!%p1616_p11)
}
0x173b   :  { %1135 = dma.vmem_to_hbm [thread:$0]  %s1133_s15, 32, %s1956_s8, [#allocation11]   ;;  %v1507_v30 = vpop.eup %1506  ;;  %v1165_v31 = vld [vmem:[%s1952_s4] ss:$0 sm:$0xff] }
0x173c   :  { %v1082_v32 = vmul.f32 %v1507_v30, %v1066_v22  ;;  %v1166_v34 = vld [vmem:[%s1953_s5] ss:$0 sm:$0xff]  ;;  %s1663_s8 = smov [#allocation9]  }
0x173d   :  { %s1109_s27 = sshll.u32 %s1663_s8, 4  ;;  %s1110_s27 = int_to_ptr.vmem [resolvable:$true] %s1109_s27 }
0x173e   :  { %v1091_v35 = vmul.f32 %v1165_v31, %v1082_v32  ;;  %s1620_s4 = scalar_lea.vmem %s1110_s27, 256  ;;  %p1625_p13 = scmp.lt.s32.totalorder %s1110_s27, %s1110_s27 }
0x173f   :  { %p1621_p12 = scmp.ne.s32.totalorder %s1110_s27, %s1620_s4  ;;  %p1626_p0 = scmp.lt.s32.totalorder %s1620_s4, %s1620_s4 }
0x1740   :  { %v1100_v36 = vadd.f32 %v1166_v34, %v1091_v35 }
0x1741   :  { %p1627_p1 = por %p1626_p0, %p1625_p13 }
0x1742   :  { %1102 = vst.msk [vmem:[#allocation9] sm:$0xff] %vm173_vm2, %v1100_v36 }
0x1743   :  { %p1628_p2 = pnand %p1627_p1, %p1621_p12 }
0x178f   :  { %v1075_v37 = vpop.xlane.xlu1 %1074 }
0x1790   :  { %v1077_v39 = vmul.f32 0.03125, %v1075_v37 }
0x1792   :  { %v1079_v41 = vadd.f32 1e-05, %v1077_v39 }
0x1794   :  { %1508 = vrsqrt.f32 %v1079_v41 }
0x179e   :  { %v1509_v42 = vpop.eup %1508 }
0x179f   :  { %v1083_v43 = vmul.f32 %v1509_v42, %v1067_v0 }
0x17a1   :  { %v1092_v44 = vmul.f32 %v1165_v31, %v1083_v43 }
0x17a3   :  { %v1101_v45 = vadd.f32 %v1166_v34, %v1092_v44 }
0x17a5   :  { %1103 = vst.msk [vmem:[#allocation9 + $0x8] sm:$0xff] %vm173_vm2, %v1101_v45 }
0x17a6   :  { %1631 = shalt.err (!%p1628_p2)
}
0x17a7   :  { %s1632_s1 = scalar_lea.hbm %s1954_s6, 256 }
0x17a8   :  { %p1633_p3 = scmp.ne.s32.totalorder %s1954_s6, %s1632_s1  ;;  %p1636_p4 = scmp.lt.u32.totalorder %s1632_s1, %s1954_s6 }
0x17aa   :  { %p1638_p5 = pnand %p1636_p4, %p1633_p3 }
0x17ac   :  { %1641 = shalt.err (!%p1638_p5)
}
0x17ad   :  { %1115 = dma.vmem_to_hbm [thread:$0]  %s1110_s27, 256, %s1954_s6, [#allocation5], %s1652_s17, %s1652_s17, %s1653_s18  }
0x17ae   :  { %1646 = dma.done.wait [#allocation5], 256  }
0x17af   :  { %1647 = vsyncadd [#allocation5], 4294967040 }
0x17b0   :  { %1648 = dma.done.wait [#allocation11], 64  }
0x17b1   :  { %1649 = vsyncadd [#allocation11], 4294967232 }
0x17b2   :  { %1145 = vsyncpa [#allocation4], 1 }
0x17b3   :  { %1146 = vsyncpa [#allocation7], 1 }
0x17b4   :  { %1147 = vsyncpa [#allocation5], 1 }
0x17b5   :  { %1148 = vsyncpa [#allocation11], 1 }

</bundles_post_ra>
